<compile_context>
chip_gen: v6e
topology: v6e:2x2x1
jax: 0.10.0
libtpu: 0.0.40
codegen_flags: <defaults>
</compile_context>

<pallas_src>
import jax
import jax.numpy as jnp
from jax.experimental import pallas as pl
from jax.experimental.pallas import tpu as pltpu


# ---------------------------------------------------------------------------
# Path A: small table -> whole (V, D) table resident in VMEM, in-kernel gather
# ---------------------------------------------------------------------------
def _make_vmem_gather_kernel(rows_per_step, k, d):
    """Gathers rows_per_step*k tokens per grid step from a VMEM-resident table.

    The output tile is lane-packed: packed row r holds tokens
    [base + r*k, base + (r+1)*k) side by side, so the tile's last dim is k*d
    (>= 128 lanes when d < 128) and the writeback DMA is lane-dense.
    """

    def kernel(idx_ref, w_ref, o_ref):
        # idx_ref: SMEM (n_pad,) int32 token ids (scalar prefetch)
        # w_ref:   VMEM (V, D)  full embedding table (copied in once)
        # o_ref:   VMEM (rows_per_step, k*d) packed output tile
        base = pl.program_id(0) * (rows_per_step * k)

        @pl.loop(0, rows_per_step)
        def _(r):
            tok_base = base + r * k
            for j in range(k):  # static -> lane offsets are compile-time consts
                tok = idx_ref[tok_base + j]
                o_ref[pl.ds(r, 1), pl.ds(j * d, d)] = w_ref[pl.ds(tok, 1), :]

    return kernel


# ---------------------------------------------------------------------------
# Path B: large table -> HBM row gather, cross-step double-buffered DMAs
# ---------------------------------------------------------------------------
def _make_hbm_gather_kernel(tm, d):
    def kernel(idx_ref, w_hbm, o_ref, buf, sem):
        # idx_ref: SMEM (n_pad,) int32 token ids (scalar prefetch)
        # w_hbm:   HBM  (V, D) embedding table (memory_space=pl.ANY)
        # o_ref:   VMEM (tm, D) output tile for this grid step
        # buf:     VMEM (2, tm, D) gather double buffer
        # sem:     DMA  (2,) one shared semaphore per buffer slot
        i = pl.program_id(0)
        nsteps = pl.num_programs(0)
        slot = i & 1
        nxt = (i + 1) & 1

        def issue(step, s):
            base = step * tm

            @pl.loop(0, tm)
            def _(t):
                row = idx_ref[base + t]           # scalar read before any wait
                pltpu.make_async_copy(
                    w_hbm.at[pl.ds(row, 1), :],   # (1, D) table row in HBM
                    buf.at[s, pl.ds(t, 1), :],    # (1, D) row of slot s
                    sem.at[s],
                ).start()

        @pl.when(i == 0)
        def _():
            issue(0, slot)                        # prologue: this step's rows

        @pl.when(i + 1 < nsteps)
        def _():
            issue(i + 1, nxt)                     # prefetch next step's rows

        # Wait for this step's tm copies; they all signaled sem[slot], and the
        # waited descriptor only has to match each copy's size.
        @pl.loop(0, tm)
        def _(t):
            pltpu.make_async_copy(
                w_hbm.at[pl.ds(0, 1), :],
                buf.at[slot, pl.ds(t, 1), :],
                sem.at[slot],
            ).wait()

        o_ref[...] = buf[slot]

    return kernel


# ---------------------------------------------------------------------------
# Wrapper
# ---------------------------------------------------------------------------
def embedding_lookup(word_index, weight, *, tokens_per_step=None,
                     vmem_table_limit_bytes=8 * 1024 * 1024):
    """Pallas equivalent of nn.Embedding(word_index) -> (*word_index.shape, D)."""
    orig_shape = word_index.shape
    v, d = weight.shape
    itemsize = jnp.dtype(weight.dtype).itemsize

    idx_flat = word_index.reshape(-1).astype(jnp.int32)
    n = int(idx_flat.shape[0])

    table_bytes = v * d * itemsize
    use_vmem_table = table_bytes <= vmem_table_limit_bytes

    # Lane packing (VMEM path only): with D < 128 pack k = 128 // D tokens per
    # packed output row so the output block's last dim is a full 128 lanes.
    if use_vmem_table and d < 128 and 128 % d == 0:
        k = 128 // d
    else:
        k = 1

    sublane = 8 * max(1, 4 // itemsize)   # 8 rows f32, 16 bf16, 32 int8
    group = sublane * k                   # tokens per full sublane row group

    # Tokens per grid step: big enough to amortize the ~0.35us/step overhead,
    # small enough that the double-buffered output tile stays well inside the
    # scoped VMEM limit on every generation (incl. v7x's 64 MiB VMEM).
    tile_budget = 2 * 1024 * 1024         # bytes per output tile buffer
    if tokens_per_step is None:
        tokens_per_step = 1024 if use_vmem_table else 256
    tm = min(int(tokens_per_step), max(1, tile_budget // (d * itemsize)))
    tm = max(group, (tm // group) * group)

    n_up = pl.cdiv(n, k) * k              # tokens filling whole packed rows
    if n_up <= tm:
        tm = n_up                         # single grid step, full-extent block
    n_pad = pl.cdiv(n, tm) * tm
    grid = n_pad // tm
    rows_per_step = tm // k

    # Pad with token 0 (padded rows are sliced off below) and clamp so a bad
    # index can never become an out-of-bounds read/DMA (nn.Embedding would
    # raise on out-of-range ids; here they are silently clamped).
    # NOTE: the flat index array lives in SMEM; multi-million-token calls
    # would need chunking at the wrapper level.
    idx_pad = jnp.clip(jnp.pad(idx_flat, (0, n_pad - n)), 0, v - 1)

    if use_vmem_table:
        out = pl.pallas_call(
            _make_vmem_gather_kernel(rows_per_step, k, d),
            out_shape=jax.ShapeDtypeStruct((n_pad // k, k * d), weight.dtype),
            grid_spec=pltpu.PrefetchScalarGridSpec(
                num_scalar_prefetch=1,                 # idx_pad -> SMEM
                grid=(grid,),
                # Whole table resident in VMEM (no blocking, copied in once).
                in_specs=[pl.BlockSpec(memory_space=pltpu.MemorySpace.VMEM)],
                out_specs=pl.BlockSpec((rows_per_step, k * d),
                                       lambda i, idx: (i, 0)),
            ),
            compiler_params=pltpu.CompilerParams(
                # Steps are independent -> shard across v7x's two TensorCores.
                dimension_semantics=("parallel",),
                vmem_limit_bytes=32 * 1024 * 1024,
            ),
        )(idx_pad, weight)
    else:
        out = pl.pallas_call(
            _make_hbm_gather_kernel(tm, d),
            out_shape=jax.ShapeDtypeStruct((n_pad, d), weight.dtype),
            grid_spec=pltpu.PrefetchScalarGridSpec(
                num_scalar_prefetch=1,                 # idx_pad -> SMEM
                grid=(grid,),
                in_specs=[pl.BlockSpec(memory_space=pl.ANY)],  # table in HBM
                out_specs=pl.BlockSpec((tm, d), lambda i, idx: (i, 0)),
                scratch_shapes=[
                    pltpu.VMEM((2, tm, d), weight.dtype),      # gather dbl buf
                    pltpu.SemaphoreType.DMA((2,)),             # one per slot
                ],
            ),
            compiler_params=pltpu.CompilerParams(
                # Cross-step prefetch carries state through scratch -> must run
                # sequentially; do NOT megacore-shard this axis.
                dimension_semantics=("arbitrary",),
                vmem_limit_bytes=32 * 1024 * 1024,
            ),
        )(idx_pad, weight)

    # Packed (n_pad//k, k*d) and flat (n_pad, d) are the same contiguous bytes.
    return out.reshape(n_pad, d)[:n].reshape(*orig_shape, d)


def random_init_embedding(vocab_size, emb_dim, key):
    # Stand-in for random_init_embedding(): uniform(-s, s), s = sqrt(3/emb_dim).
    scale = jnp.sqrt(3.0 / emb_dim)
    return jax.random.uniform(
        key, (vocab_size, emb_dim), dtype=jnp.float32, minval=-scale, maxval=scale
    )


# TODO(synk): pretrained-embedding loading (load_pretrain_embedding) is file
# I/O with no Pallas equivalent; only the random-init path is implemented.


if __name__ == "__main__":
    key = jax.random.PRNGKey(0)
    k_w, k_idx = jax.random.split(key)

    vocab_size, emb_dim = 64, 32
    batch, seq = 2, 8

    weight = random_init_embedding(vocab_size, emb_dim, k_w)              # (V, D)
    word_index = jax.random.randint(
        k_idx, (batch, seq), 0, vocab_size, dtype=jnp.int32)              # (B, S)
    ref = weight[word_index]

    # 1) VMEM fast path (small table), single grid step, lane-packed output.
    out = jax.block_until_ready(embedding_lookup(word_index, weight))
    assert out.shape == (batch, seq, emb_dim) and out.dtype == weight.dtype
    assert jnp.array_equal(out, ref), "VMEM path mismatch"

    # 2) VMEM fast path, multi-step grid (exercises tiling + packing).
    big_idx = jax.random.randint(
        jax.random.PRNGKey(1), (4, 64), 0, vocab_size, dtype=jnp.int32)
    out_big = jax.block_until_ready(
        embedding_lookup(big_idx, weight, tokens_per_step=64))
    assert jnp.array_equal(out_big, weight[big_idx]), "VMEM multi-step mismatch"

    # 3) HBM fallback path (forced), multi-step -> exercises the cross-step
    #    double-buffered DMA gather.
    out_hbm = jax.block_until_ready(
        embedding_lookup(word_index, weight,
                         vmem_table_limit_bytes=0, tokens_per_step=8))
    assert jnp.array_equal(out_hbm, ref), "HBM path mismatch"

    print("KERNEL_OK")
</pallas_src>

<mosaic_0001>
module attributes {stable_mosaic.version = 11 : i64} {
  func.func @kernel(%arg0: i32, %arg1: memref<16xi32, #tpu.memory_space<smem>>, %arg2: memref<64x32xf32, #tpu.memory_space<vmem>>, %arg3: memref<4x128xf32, #tpu.memory_space<vmem>>) attributes {dimension_semantics = [#tpu.dimension_semantics<parallel>], iteration_bounds = array<i64: 1>, scalar_prefetch = 1 : i64, scratch_operands = 0 : i64, tpu.core_type = #tpu.core_type<tc>, window_params = [{pipeline_mode = #tpu.pipeline_mode<synchronous>, transform_indices = @transform_0, window_bounds = array<i64: 64, 32>}, {transform_indices = @transform_1, window_bounds = array<i64: 4, 128>}]} {
    %c16_i32 = arith.constant 16 : i32
    %0 = arith.muli %arg0, %c16_i32 : i32
    %c0_i32 = arith.constant 0 : i32
    %c4_i32 = arith.constant 4 : i32
    %1 = arith.addi %c0_i32, %c4_i32 : i32
    %c1_i32 = arith.constant 1 : i32
    scf.for %arg4 = %c0_i32 to %1 step %c1_i32  : i32 {
      %c1_i32_1 = arith.constant 1 : i32
      %2 = arith.muli %arg4, %c1_i32_1 : i32
      %c0_i32_2 = arith.constant 0 : i32
      %3 = arith.addi %c0_i32_2, %2 : i32
      %c4_i32_3 = arith.constant 4 : i32
      %4 = arith.muli %3, %c4_i32_3 : i32
      %5 = arith.addi %0, %4 : i32
      %c0_i32_4 = arith.constant 0 : i32
      %6 = arith.addi %5, %c0_i32_4 : i32
      %7 = arith.index_cast %6 : i32 to index
      %8 = memref.load %arg1[%7] : memref<16xi32, #tpu.memory_space<smem>>
      %9 = arith.index_cast %8 : i32 to index
      %c0 = arith.constant 0 : index
      %10 = vector.load %arg2[%9, %c0] : memref<64x32xf32, #tpu.memory_space<vmem>>, vector<1x32xf32>
      %11 = arith.index_cast %3 : i32 to index
      %c0_5 = arith.constant 0 : index
      %12 = vector.load %arg3[%11, %c0_5] : memref<4x128xf32, #tpu.memory_space<vmem>>, vector<1x32xf32>
      tpu.vector_store %arg3[%11, %c0_5], %10 {strides = array<i32>} : memref<4x128xf32, #tpu.memory_space<vmem>>, vector<1x32xf32>,
      %c1_i32_6 = arith.constant 1 : i32
      %13 = arith.addi %5, %c1_i32_6 : i32
      %14 = arith.index_cast %13 : i32 to index
      %15 = memref.load %arg1[%14] : memref<16xi32, #tpu.memory_space<smem>>
      %16 = arith.index_cast %15 : i32 to index
      %c0_7 = arith.constant 0 : index
      %17 = vector.load %arg2[%16, %c0_7] : memref<64x32xf32, #tpu.memory_space<vmem>>, vector<1x32xf32>
      %18 = arith.index_cast %3 : i32 to index
      %c32 = arith.constant 32 : index
      %19 = vector.load %arg3[%18, %c32] : memref<4x128xf32, #tpu.memory_space<vmem>>, vector<1x32xf32>
      tpu.vector_store %arg3[%18, %c32], %17 {strides = array<i32>} : memref<4x128xf32, #tpu.memory_space<vmem>>, vector<1x32xf32>,
      %c2_i32 = arith.constant 2 : i32
      %20 = arith.addi %5, %c2_i32 : i32
      %21 = arith.index_cast %20 : i32 to index
      %22 = memref.load %arg1[%21] : memref<16xi32, #tpu.memory_space<smem>>
      %23 = arith.index_cast %22 : i32 to index
      %c0_8 = arith.constant 0 : index
      %24 = vector.load %arg2[%23, %c0_8] : memref<64x32xf32, #tpu.memory_space<vmem>>, vector<1x32xf32>
      %25 = arith.index_cast %3 : i32 to index
      %c64 = arith.constant 64 : index
      %26 = vector.load %arg3[%25, %c64] : memref<4x128xf32, #tpu.memory_space<vmem>>, vector<1x32xf32>
      tpu.vector_store %arg3[%25, %c64], %24 {strides = array<i32>} : memref<4x128xf32, #tpu.memory_space<vmem>>, vector<1x32xf32>,
      %c3_i32 = arith.constant 3 : i32
      %27 = arith.addi %5, %c3_i32 : i32
      %28 = arith.index_cast %27 : i32 to index
      %29 = memref.load %arg1[%28] : memref<16xi32, #tpu.memory_space<smem>>
      %30 = arith.index_cast %29 : i32 to index
      %c0_9 = arith.constant 0 : index
      %31 = vector.load %arg2[%30, %c0_9] : memref<64x32xf32, #tpu.memory_space<vmem>>, vector<1x32xf32>
      %32 = arith.index_cast %3 : i32 to index
      %c96 = arith.constant 96 : index
      %33 = vector.load %arg3[%32, %c96] : memref<4x128xf32, #tpu.memory_space<vmem>>, vector<1x32xf32>
      tpu.vector_store %arg3[%32, %c96], %31 {strides = array<i32>} : memref<4x128xf32, #tpu.memory_space<vmem>>, vector<1x32xf32>,
    }
    %c4_i32_0 = arith.constant 4 : i32
    return
  }
  func.func @transform_0(%arg0: i32, %arg1: memref<16xi32, #tpu.memory_space<smem>>) -> (i32, i32) {
    %c0_i32 = arith.constant 0 : i32
    %c0_i32_0 = arith.constant 0 : i32
    %c0_i32_1 = arith.constant 0 : i32
    return %c0_i32, %c0_i32_0 : i32, i32
  }
  func.func @transform_1(%arg0: i32, %arg1: memref<16xi32, #tpu.memory_space<smem>>) -> (i32, i32) {
    %c0_i32 = arith.constant 0 : i32
    %c0_i32_0 = arith.constant 0 : i32
    return %arg0, %c0_i32 : i32, i32
  }
}

</mosaic_0001>

<bundles_post_ra>
// kernel: tpu_custom_call.1
= control target key start
LH: loop header
LB: loop body
LE: loop exit
PB: predicated region body
PF: predicated region fallthrough
CT: control target
= control target key end

     0   :  { %s191_s0 = inlined_call_operand.vmem [shape: s32[16], index: 0, kind: input, shape index: {}]   ;;  %s192_s1 = inlined_call_operand.vmem [shape: f32[64,32], index: 1, kind: input, shape index: {}]   ;;  %s193_s2 = inlined_call_operand.hbm [shape: f32[4,128], index: 2, kind: output, shape index: {}]  }
   0x1   :  { %s7_s11 = sshll.u32 %s191_s0, 4  ;;  %s8_s11 = int_to_ptr.vmem [resolvable:$true] %s7_s11 }
   0x2   :  { %s99_s12 = scalar_lea.vmem %s8_s11, 16  ;;  %p104_p1 = scmp.lt.s32.totalorder %s8_s11, %s8_s11 }
   0x3   :  { %p100_p0 = scmp.ne.s32.totalorder %s8_s11, %s99_s12  ;;  %p105_p2 = scmp.lt.s32.totalorder %s99_s12, %s99_s12 }
   0x5   :  { %p106_p3 = por %p105_p2, %p104_p1 }
   0x7   :  { %p107_p4 = pnand %p106_p3, %p100_p0 }
   0x9   :  { %110 = shalt.err (!%p107_p4)  }
   0xa   :  { %s143_s13 = smov [#allocation3]  }
   0xb   :  { %10 = dma.vmem_to_smem %s8_s11, 16, %s143_s13, [#allocation2] }
   0xc   :  { %135 = dma.done.wait [#allocation2], 16 }
   0xd   :  { %136 = vsyncadd [#allocation2], 4294967280 }
   0xe   :  { %12 = sfence }
   0xf   :  { %13 = vsyncpa [#allocation5], 0  ;;  %s166_s14 = smov 0  }
  0x10 LB: > { %s85_s0 = sshll.u32 %s141_s14, 2  ;;  %vm29_vm0 = vcmask 253952   ;;  %s28_s3 = scalar_lea.vmem [#allocation4], %s141_s14  ;;  %vm39_vm1 = vcmask 516352   ;;  %vm49_vm2 = vcmask 778752   ;;  %vm59_vm3 = vcmask 1041152   ;;  %s141_s14 = sphi %s166_s14, %s22_s14  }
  0x11   : > { %s31_s15 = sadd.s32 1, %s85_s0  ;;  %s25_s16 = sld [smem:[#allocation3 + %s85_s0]] }
  0x12   : > { %s32_s17 = sld [smem:[#allocation3 + %s31_s15]]  ;;  %s41_s18 = sadd.s32 2, %s85_s0 }
  0x13   : > { %s42_s19 = sld [smem:[#allocation3 + %s41_s18]]  ;;  %s51_s20 = sadd.s32 3, %s85_s0 }
  0x14   : > { %s52_s21 = sld [smem:[#allocation3 + %s51_s20]]  ;;  %s144_s4 = smov 32  }
  0x15   : > { %s145_s8 = smov 96   ;;  %s146_s9 = smov 64  }
  0x16   : > { %s22_s14 = sadd.s32 1, %s141_s14  }
  0x17   : > { %s26_s24 = scalar_lea.vmem %s192_s1, %s25_s16  ;;  %p19_p5 = scmp.ge.s32.totalorder %s22_s14, 4  }
  0x18   : > { %s33_s27 = scalar_lea.vmem %s192_s1, %s32_s17  ;;  %v27_v0 = vld [vmem:[%s26_s24] sm:$0x1]  ;;  %s147_s10 = smov (%p19_p5), [#allocation4]  }
  0x19   : > { %v34_v1 = vld [vmem:[%s33_s27] sm:$0x1]  ;;  %s43_s30 = scalar_lea.vmem %s192_s1, %s42_s19  ;;  %30 = vst.msk [vmem:[%s28_s3] sm:$0x1] %vm29_vm0, %v27_v0  ;;  %s67_s11 = sshll.u32 (%p19_p5), %s147_s10, 4  ;;  %s68_s11 = int_to_ptr.vmem [resolvable:$true] %s67_s11 }
  0x1a   : > { %36 = vrot.lane.b32.xlu0 %v34_v1, %s144_s4  ;;  %s53_s7 = scalar_lea.vmem %s192_s1, %s52_s21  ;;  %v44_v2 = vld [vmem:[%s43_s30] sm:$0x1]  ;;  %s111_s12 = scalar_lea.vmem (%p19_p5), %s68_s11, 64 }
  0x1b   : > { %v54_v3 = vld [vmem:[%s53_s7] sm:$0x1]  ;;  %p112_p6 = scmp.ne.s32.totalorder (%p19_p5), %s68_s11, %s111_s12  ;;  %p116_p7 = scmp.lt.s32.totalorder (%p19_p5), %s68_s11, %s68_s11 }
  0x1c   : > { %56 = vrot.lane.b32.xlu1 %v54_v3, %s145_s8  ;;  %p117_p8 = scmp.lt.s32.totalorder (%p19_p5), %s111_s12, %s111_s12 }
  0x1e   : > { %46 = vrot.lane.b32.xlu0 %v44_v2, %s146_s9  ;;  %p118_p9 = por (%p19_p5), %p117_p8, %p116_p7 }
  0x20   :  { %p119_p10 = pnand (%p19_p5), %p118_p9, %p112_p6 }
  0x8c   : > { %v37_v4 = vpop.permute.xlu0 %36 }
  0x8d   : > { %40 = vst.msk [vmem:[%s28_s3] sm:$0x1] %vm39_vm1, %v37_v4 }
  0x8e   : > { %v57_v5 = vpop.permute.xlu1 %56  ;;  %21 = sbr.rel (!%p19_p5) target bundleno = 16 (0x10), region = 36 }
  0x90   : > { %v47_v6 = vpop.permute.xlu0 %46 }
  0x91   : > { %50 = vst.msk [vmem:[%s28_s3] sm:$0x1] %vm49_vm2, %v47_v6 }
  0x92   : > { %60 = vst.msk [vmem:[%s28_s3] sm:$0x1] %vm59_vm3, %v57_v5 }
  0x93   :  { %122 = shalt.err (!%p119_p10)
}
  0x94   :  { %70 = dma.vmem_to_hbm [thread:$0]  %s68_s11, 64, %s193_s2, [#allocation5]  }
  0x95   :  { %137 = dma.done.wait [#allocation5], 64  }
  0x96   :  { %138 = vsyncadd [#allocation5], 4294967232 }
  0x97   :  { %74 = vsyncpa [#allocation5], 1 }

</bundles_post_ra>
